<compile_context>
chip_gen: v5e
topology: v5e:2x2
jax: 0.10.0
libtpu: 0.0.40
codegen_flags: <defaults>
</compile_context>

<pallas_src>
import functools

import jax
import jax.numpy as jnp
from jax import lax
from jax.experimental import pallas as pl
from jax.experimental.pallas import tpu as pltpu


ACC_LANES = 128  # width of the narrow VMEM accumulators (one vreg of lanes)


def _round_up(x, m):
    return ((x + m - 1) // m) * m


def _channel_attention_kernel(x_ref, w1t_ref, w2t_ref, o_ref,
                              sum_acc, max_acc, *,
                              inv_hw, hw, lane_tile, acc_lanes, needs_mask):
    # x_ref  : (b_tile, C, lane_tile) tile of the flattened input, NATIVE dtype
    # w1t_ref: (C, Ch)  f32  (first 1x1 conv weight, pre-transposed)
    # w2t_ref: (Ch, C)  f32  (second 1x1 conv weight, pre-transposed)
    # o_ref  : (b_tile, C) — written only on the last HW step
    # sum_acc: (b_tile, C, acc_lanes) f32 VMEM running sum
    # max_acc: (b_tile, C, acc_lanes) input-dtype VMEM running max
    k = pl.program_id(1)
    n_k = pl.num_programs(1)

    @pl.when(k == 0)
    def _init():
        sum_acc[...] = jnp.zeros_like(sum_acc)
        max_acc[...] = jnp.full(max_acc.shape, -jnp.inf, dtype=max_acc.dtype)

    # Fold the streamed tile into the narrow accumulators, one 128-lane
    # sub-slice at a time (statically unrolled).  Per-step work is pure VPU
    # add/max; the single cross-lane (XLU) reduce happens once in finalize.
    n_sub = lane_tile // acc_lanes
    base = k * lane_tile
    for j in range(n_sub):
        xs = x_ref[:, :, pl.ds(j * acc_lanes, acc_lanes)]  # native dtype
        if needs_mask:
            pos = (base + j * acc_lanes
                   + lax.broadcasted_iota(jnp.int32, xs.shape, 2))
            valid = pos < hw
            xs_sum = jnp.where(valid, xs, jnp.zeros_like(xs)).astype(jnp.float32)
            xs_max = jnp.where(valid, xs, jnp.full_like(xs, -jnp.inf))
        else:
            xs_sum = xs.astype(jnp.float32)
            xs_max = xs
        sum_acc[...] += xs_sum
        max_acc[...] = jnp.maximum(max_acc[...], xs_max)

    @pl.when(k == n_k - 1)
    def _finalize():
        # One cross-lane reduce each (XLU), then the tiny shared MLP.
        avg_pool = jnp.sum(sum_acc[...], axis=-1) * inv_hw          # (bt, C) f32
        max_pool = jnp.max(max_acc[...], axis=-1).astype(jnp.float32)
        bt = avg_pool.shape[0]

        # Fused FC: one pair of matmuls covers both pooled vectors.
        pooled = jnp.concatenate([avg_pool, max_pool], axis=0)      # (2*bt, C)
        h = jnp.dot(pooled, w1t_ref[...],
                    preferred_element_type=jnp.float32)              # (2*bt, Ch)
        h = jnp.maximum(h, 0.0)                                      # ReLU
        y = jnp.dot(h, w2t_ref[...],
                    preferred_element_type=jnp.float32)              # (2*bt, C)

        out = y[:bt] + y[bt:]                                        # avg + max
        o_ref[...] = jax.nn.sigmoid(out).astype(o_ref.dtype)


def channel_attention(x, w1, w2, *, b_tile=None, lane_tile=None, n_buffers=2,
                      acc_lanes=ACC_LANES):
    """CBAM channel attention.

    x : (B, C, H, W) float32/bfloat16 (kept in native dtype — no upcast)
    w1: (Ch, C) — Conv2d(C, Ch, 1, bias=False).weight squeezed
    w2: (C, Ch) — Conv2d(Ch, C, 1, bias=False).weight squeezed
    Returns (B, C, 1, 1) in x.dtype, matching the PyTorch module's output.
    """
    B, C, H, W = x.shape
    Ch = w1.shape[0]
    HW = H * W
    x_dtype = x.dtype
    x_bytes = x.dtype.itemsize

    # Generation-aware VMEM budget (v7x: 64 MiB/TC; v5e/v6e: 128 MiB).
    try:
        vmem_cap = int(pltpu.get_tpu_info().vmem_capacity_bytes)
    except Exception:  # pragma: no cover - conservative fallback
        vmem_cap = 64 * 1024 * 1024
    budget = int(0.6 * vmem_cap)

    if b_tile is None:
        # Give the "parallel" batch axis >= 2 blocks when B allows, so a
        # megacore (v7x) chip can shard it across both TensorCores.
        if B >= 16 and B % 2 == 0 and (B // 2) % 8 == 0:
            b_tile = B // 2
        else:
            b_tile = B
    assert B % b_tile == 0, "b_tile must divide B"
    assert b_tile == B or b_tile % 8 == 0, "b_tile must be B or a multiple of 8"

    hw_pad = _round_up(HW, 128)
    if lane_tile is None:
        # Size the streamed x tile from the VMEM budget: n_buffers x tiles
        # + narrow accumulators + weights/output, per-buffer tile <= ~16 MiB.
        fixed = (4 * (2 * C * Ch + 2 * b_tile * C)
                 + b_tile * C * acc_lanes * (4 + x_bytes))
        chunk_bytes = b_tile * C * 128 * x_bytes
        budget_chunks = max(1, (budget - fixed) // (n_buffers * chunk_bytes))
        cap_chunks = max(1, (16 * 1024 * 1024) // chunk_bytes)
        lane_tile = 128 * int(min(budget_chunks, cap_chunks, hw_pad // 128))
    assert lane_tile % 128 == 0 and lane_tile >= 128, \
        "lane_tile must be a positive multiple of 128"
    lane_tile = min(lane_tile, hw_pad)

    n_b = B // b_tile
    n_hw = int(pl.cdiv(HW, lane_tile))
    needs_mask = (HW % lane_tile) != 0

    x_flat = x.reshape(B, C, HW)                 # native dtype, no copy/upcast
    # Pre-transpose weights in the wrapper (no in-kernel .T / XLU transpose).
    w1t = jnp.asarray(w1, jnp.float32).T         # (C, Ch)
    w2t = jnp.asarray(w2, jnp.float32).T         # (Ch, C)

    kernel = functools.partial(
        _channel_attention_kernel,
        inv_hw=1.0 / HW, hw=HW, lane_tile=lane_tile,
        acc_lanes=acc_lanes, needs_mask=needs_mask)

    x_tile_bytes = b_tile * C * lane_tile * x_bytes
    acc_bytes = b_tile * C * acc_lanes * (4 + x_bytes)
    est_bytes = (n_buffers * x_tile_bytes + acc_bytes
                 + 4 * (2 * C * Ch + 2 * b_tile * C))
    vmem_limit = int(min(int(0.85 * vmem_cap),
                         max(2 * est_bytes, 32 * 1024 * 1024)))

    cost = pl.CostEstimate(
        flops=int(2 * B * C * HW + 8 * B * C * Ch),
        transcendentals=int(B * C),
        bytes_accessed=int(x_bytes * B * C * HW           # streamed input
                           + 4 * 2 * C * Ch               # weights
                           + x_bytes * B * C),             # output
    )

    x_spec_kwargs = {}
    if n_buffers != 2:
        # Deeper pipelining (e.g. 3-deep on v7x) when explicitly requested.
        x_spec_kwargs["pipeline_mode"] = pl.Buffered(n_buffers)

    out = pl.pallas_call(
        kernel,
        out_shape=jax.ShapeDtypeStruct((B, C), x_dtype),
        grid_spec=pltpu.PrefetchScalarGridSpec(
            num_scalar_prefetch=0,
            grid=(n_b, n_hw),
            in_specs=[
                pl.BlockSpec((b_tile, C, lane_tile), lambda i, k: (i, 0, k),
                             **x_spec_kwargs),
                pl.BlockSpec((C, Ch), lambda i, k: (0, 0)),
                pl.BlockSpec((Ch, C), lambda i, k: (0, 0)),
            ],
            out_specs=pl.BlockSpec((b_tile, C), lambda i, k: (i, 0)),
            scratch_shapes=[
                pltpu.VMEM((b_tile, C, acc_lanes), jnp.float32),   # running sum
                pltpu.VMEM((b_tile, C, acc_lanes), x_dtype),       # running max
            ],
        ),
        compiler_params=pltpu.CompilerParams(
            dimension_semantics=("parallel", "arbitrary"),
            vmem_limit_bytes=vmem_limit,
        ),
        cost_estimate=cost,
    )(x_flat, w1t, w2t)

    # TODO(synk): for C < 128 the (B, C) output store is lane-masked; it is a
    # one-shot write per batch tile, so padding C is not worth it.
    return out.reshape(B, C, 1, 1)


def reference(x, w1, w2):
    # Pure-JAX reference mirroring the PyTorch forward (computed in f32).
    xf = x.astype(jnp.float32)
    avg = jnp.mean(xf, axis=(2, 3))                      # (B, C)
    mx = jnp.max(xf, axis=(2, 3))                        # (B, C)

    def fc(v):
        h = jnp.maximum(v @ w1.T, 0.0)
        return h @ w2.T

    return jax.nn.sigmoid(fc(avg) + fc(mx))[:, :, None, None]


if __name__ == "__main__":
    B, C, H, W = 2, 32, 15, 15          # H*W = 225: NOT a multiple of 128
    ratio = 16
    Ch = C // ratio                      # hidden channels = 2

    key = jax.random.PRNGKey(0)
    kx, k1, k2 = jax.random.split(key, 3)

    x = jax.random.normal(kx, (B, C, H, W), dtype=jnp.float32)
    # Conv2d(C, Ch, 1, bias=False).weight (Ch, C, 1, 1) -> squeeze to (Ch, C)
    w1 = jax.random.normal(k1, (Ch, C), dtype=jnp.float32) * 0.1
    # Conv2d(Ch, C, 1, bias=False).weight (C, Ch, 1, 1) -> squeeze to (C, Ch)
    w2 = jax.random.normal(k2, (C, Ch), dtype=jnp.float32) * 0.1

    ref = reference(x, w1, w2)

    # 1) auto tile selection (single HW step here, tail masked)
    out_auto = channel_attention(x, w1, w2)
    jax.block_until_ready(out_auto)
    assert out_auto.shape == (B, C, 1, 1)
    assert jnp.allclose(out_auto, ref, atol=1e-5, rtol=1e-5), "auto-tile mismatch"

    # 2) forced lane_tile=128 -> 2 HW steps: exercises init/accumulate/finalize
    #    plus the tail-masking path (225 % 128 != 0).
    out_tiled = channel_attention(x, w1, w2, lane_tile=128)
    jax.block_until_ready(out_tiled)
    assert jnp.allclose(out_tiled, ref, atol=1e-5, rtol=1e-5), "tiled mismatch"

    # 3) bf16 input streamed in its native dtype (f32 sum acc inside the kernel).
    x_bf16 = x.astype(jnp.bfloat16)
    out_bf16 = channel_attention(x_bf16, w1, w2, lane_tile=128)
    jax.block_until_ready(out_bf16)
    ref_bf16 = reference(x_bf16, w1, w2)
    assert out_bf16.dtype == jnp.bfloat16
    assert jnp.max(jnp.abs(out_bf16.astype(jnp.float32) - ref_bf16)) < 2e-2, \
        "bf16 mismatch"

    print("KERNEL_OK")
</pallas_src>

<mosaic_0001>
module attributes {stable_mosaic.version = 11 : i64} {
  func.func @_channel_attention_kernel(%arg0: i32, %arg1: i32, %arg2: memref<2x32x256xf32, #tpu.memory_space<vmem>>, %arg3: memref<32x2xf32, #tpu.memory_space<vmem>>, %arg4: memref<2x32xf32, #tpu.memory_space<vmem>>, %arg5: memref<2x32xf32, #tpu.memory_space<vmem>>, %arg6: memref<2x32x128xf32, #tpu.memory_space<vmem>>, %arg7: memref<2x32x128xf32, #tpu.memory_space<vmem>>) attributes {dimension_semantics = [#tpu.dimension_semantics<parallel>, #tpu.dimension_semantics<arbitrary>], iteration_bounds = array<i64: 1, 1>, scalar_prefetch = 0 : i64, scratch_operands = 2 : i64, tpu.core_type = #tpu.core_type<tc>, window_params = [{transform_indices = @transform_0, window_bounds = array<i64: 2, 32, 256>}, {pipeline_mode = #tpu.pipeline_mode<synchronous>, transform_indices = @transform_1, window_bounds = array<i64: 32, 2>}, {pipeline_mode = #tpu.pipeline_mode<synchronous>, transform_indices = @transform_2, window_bounds = array<i64: 2, 32>}, {transform_indices = @transform_3, window_bounds = array<i64: 2, 32>}]} {
    %c0_i32 = arith.constant 0 : i32
    %0 = arith.cmpi eq, %arg1, %c0_i32 : i32
    %1 = arith.extui %0 : i1 to i32
    %c0_i32_0 = arith.constant 0 : i32
    %2 = arith.cmpi ne, %1, %c0_i32_0 : i32
    scf.if %2 {
      %cst_36 = arith.constant 0.000000e+00 : f32
      %41 = vector.broadcast %cst_36 : f32 to vector<2x32x128xf32>
      %c0_37 = arith.constant 0 : index
      %c0_38 = arith.constant 0 : index
      %c0_39 = arith.constant 0 : index
      %42 = vector.load %arg6[%c0_37, %c0_38, %c0_39] : memref<2x32x128xf32, #tpu.memory_space<vmem>>, vector<2x32x128xf32>
      tpu.vector_store %arg6[%c0_37, %c0_38, %c0_39], %41 {strides = array<i32>} : memref<2x32x128xf32, #tpu.memory_space<vmem>>, vector<2x32x128xf32>,
      %cst_40 = arith.constant 0xFF800000 : f32
      %43 = vector.broadcast %cst_40 : f32 to vector<2x32x128xf32>
      %c0_41 = arith.constant 0 : index
      %c0_42 = arith.constant 0 : index
      %c0_43 = arith.constant 0 : index
      %44 = vector.load %arg7[%c0_41, %c0_42, %c0_43] : memref<2x32x128xf32, #tpu.memory_space<vmem>>, vector<2x32x128xf32>
      tpu.vector_store %arg7[%c0_41, %c0_42, %c0_43], %43 {strides = array<i32>} : memref<2x32x128xf32, #tpu.memory_space<vmem>>, vector<2x32x128xf32>,
    } else {
    }
    %c256_i32 = arith.constant 256 : i32
    %3 = arith.muli %arg1, %c256_i32 : i32
    %c0 = arith.constant 0 : index
    %c0_1 = arith.constant 0 : index
    %c0_2 = arith.constant 0 : index
    %4 = vector.load %arg2[%c0, %c0_1, %c0_2] : memref<2x32x256xf32, #tpu.memory_space<vmem>>, vector<2x32x128xf32>
    %c0_i32_3 = arith.constant 0 : i32
    %5 = arith.addi %3, %c0_i32_3 : i32
    %6 = tpu.iota {dimensions = array<i32: 2>} : vector<2x32x128xi32>
    %7 = vector.broadcast %5 : i32 to vector<2x32x128xi32>
    %8 = arith.addi %7, %6 : vector<2x32x128xi32>
    %c225_i32 = arith.constant 225 : i32
    %9 = vector.broadcast %c225_i32 : i32 to vector<2x32x128xi32>
    %10 = arith.cmpi slt, %8, %9 : vector<2x32x128xi32>
    %cst = arith.constant 0.000000e+00 : f32
    %11 = vector.broadcast %cst : f32 to vector<2x32x128xf32>
    %12 = arith.select %10, %4, %11 : vector<2x32x128xi1>, vector<2x32x128xf32>
    %cst_4 = arith.constant 0xFF800000 : f32
    %13 = vector.broadcast %cst_4 : f32 to vector<2x32x128xf32>
    %14 = arith.select %10, %4, %13 : vector<2x32x128xi1>, vector<2x32x128xf32>
    %c0_5 = arith.constant 0 : index
    %c0_6 = arith.constant 0 : index
    %c0_7 = arith.constant 0 : index
    %15 = vector.load %arg6[%c0_5, %c0_6, %c0_7] : memref<2x32x128xf32, #tpu.memory_space<vmem>>, vector<2x32x128xf32>
    %16 = arith.addf %15, %12 : vector<2x32x128xf32>
    %c0_8 = arith.constant 0 : index
    %c0_9 = arith.constant 0 : index
    %c0_10 = arith.constant 0 : index
    %17 = vector.load %arg6[%c0_8, %c0_9, %c0_10] : memref<2x32x128xf32, #tpu.memory_space<vmem>>, vector<2x32x128xf32>
    tpu.vector_store %arg6[%c0_8, %c0_9, %c0_10], %16 {strides = array<i32>} : memref<2x32x128xf32, #tpu.memory_space<vmem>>, vector<2x32x128xf32>,
    %c0_11 = arith.constant 0 : index
    %c0_12 = arith.constant 0 : index
    %c0_13 = arith.constant 0 : index
    %18 = vector.load %arg7[%c0_11, %c0_12, %c0_13] : memref<2x32x128xf32, #tpu.memory_space<vmem>>, vector<2x32x128xf32>
    %19 = arith.maximumf %18, %14 : vector<2x32x128xf32>
    %c0_14 = arith.constant 0 : index
    %c0_15 = arith.constant 0 : index
    %c0_16 = arith.constant 0 : index
    %20 = vector.load %arg7[%c0_14, %c0_15, %c0_16] : memref<2x32x128xf32, #tpu.memory_space<vmem>>, vector<2x32x128xf32>
    tpu.vector_store %arg7[%c0_14, %c0_15, %c0_16], %19 {strides = array<i32>} : memref<2x32x128xf32, #tpu.memory_space<vmem>>, vector<2x32x128xf32>,
    %c0_17 = arith.constant 0 : index
    %c0_18 = arith.constant 0 : index
    %c128 = arith.constant 128 : index
    %21 = vector.load %arg2[%c0_17, %c0_18, %c128] : memref<2x32x256xf32, #tpu.memory_space<vmem>>, vector<2x32x128xf32>
    %c128_i32 = arith.constant 128 : i32
    %22 = arith.addi %3, %c128_i32 : i32
    %23 = tpu.iota {dimensions = array<i32: 2>} : vector<2x32x128xi32>
    %24 = vector.broadcast %22 : i32 to vector<2x32x128xi32>
    %25 = arith.addi %24, %23 : vector<2x32x128xi32>
    %c225_i32_19 = arith.constant 225 : i32
    %26 = vector.broadcast %c225_i32_19 : i32 to vector<2x32x128xi32>
    %27 = arith.cmpi slt, %25, %26 : vector<2x32x128xi32>
    %cst_20 = arith.constant 0.000000e+00 : f32
    %28 = vector.broadcast %cst_20 : f32 to vector<2x32x128xf32>
    %29 = arith.select %27, %21, %28 : vector<2x32x128xi1>, vector<2x32x128xf32>
    %cst_21 = arith.constant 0xFF800000 : f32
    %30 = vector.broadcast %cst_21 : f32 to vector<2x32x128xf32>
    %31 = arith.select %27, %21, %30 : vector<2x32x128xi1>, vector<2x32x128xf32>
    %c0_22 = arith.constant 0 : index
    %c0_23 = arith.constant 0 : index
    %c0_24 = arith.constant 0 : index
    %32 = vector.load %arg6[%c0_22, %c0_23, %c0_24] : memref<2x32x128xf32, #tpu.memory_space<vmem>>, vector<2x32x128xf32>
    %33 = arith.addf %32, %29 : vector<2x32x128xf32>
    %c0_25 = arith.constant 0 : index
    %c0_26 = arith.constant 0 : index
    %c0_27 = arith.constant 0 : index
    %34 = vector.load %arg6[%c0_25, %c0_26, %c0_27] : memref<2x32x128xf32, #tpu.memory_space<vmem>>, vector<2x32x128xf32>
    tpu.vector_store %arg6[%c0_25, %c0_26, %c0_27], %33 {strides = array<i32>} : memref<2x32x128xf32, #tpu.memory_space<vmem>>, vector<2x32x128xf32>,
    %c0_28 = arith.constant 0 : index
    %c0_29 = arith.constant 0 : index
    %c0_30 = arith.constant 0 : index
    %35 = vector.load %arg7[%c0_28, %c0_29, %c0_30] : memref<2x32x128xf32, #tpu.memory_space<vmem>>, vector<2x32x128xf32>
    %36 = arith.maximumf %35, %31 : vector<2x32x128xf32>
    %c0_31 = arith.constant 0 : index
    %c0_32 = arith.constant 0 : index
    %c0_33 = arith.constant 0 : index
    %37 = vector.load %arg7[%c0_31, %c0_32, %c0_33] : memref<2x32x128xf32, #tpu.memory_space<vmem>>, vector<2x32x128xf32>
    tpu.vector_store %arg7[%c0_31, %c0_32, %c0_33], %36 {strides = array<i32>} : memref<2x32x128xf32, #tpu.memory_space<vmem>>, vector<2x32x128xf32>,
    %c0_i32_34 = arith.constant 0 : i32
    %38 = arith.cmpi eq, %arg1, %c0_i32_34 : i32
    %39 = arith.extui %38 : i1 to i32
    %c0_i32_35 = arith.constant 0 : i32
    %40 = arith.cmpi ne, %39, %c0_i32_35 : i32
    scf.if %40 {
      %c0_36 = arith.constant 0 : index
      %c0_37 = arith.constant 0 : index
      %c0_38 = arith.constant 0 : index
      %41 = vector.load %arg6[%c0_36, %c0_37, %c0_38] : memref<2x32x128xf32, #tpu.memory_space<vmem>>, vector<2x32x128xf32>
      %cst_39 = arith.constant dense<0.000000e+00> : vector<2x32xf32>
      %42 = vector.multi_reduction <add>, %41, %cst_39 [2] : vector<2x32x128xf32> to vector<2x32xf32>
      %cst_40 = arith.constant 0.00444444455 : f32
      %43 = vector.broadcast %cst_40 : f32 to vector<2x32xf32>
      %44 = arith.mulf %42, %43 : vector<2x32xf32>
      %c0_41 = arith.constant 0 : index
      %c0_42 = arith.constant 0 : index
      %c0_43 = arith.constant 0 : index
      %45 = vector.load %arg7[%c0_41, %c0_42, %c0_43] : memref<2x32x128xf32, #tpu.memory_space<vmem>>, vector<2x32x128xf32>
      %cst_44 = arith.constant dense<0xFF800000> : vector<2x32xf32>
      %46 = vector.multi_reduction <maximumf>, %45, %cst_44 [2] : vector<2x32x128xf32> to vector<2x32xf32>
      %47 = tpu.concatenate %44, %46 in 0 : vector<2x32xf32>, vector<2x32xf32> -> vector<4x32xf32>
      %c0_45 = arith.constant 0 : index
      %c0_46 = arith.constant 0 : index
      %48 = vector.load %arg3[%c0_45, %c0_46] : memref<32x2xf32, #tpu.memory_space<vmem>>, vector<32x2xf32>
      %cst_47 = arith.constant dense<0.000000e+00> : vector<4x2xf32>
      %49 = tpu.matmul %47, %48, %cst_47 {dimension_numbers = #tpu.dot_dimension_numbers<[1], [0], [0], [1], [0, 0, 1, 1], [], []>} : vector<4x32xf32>, vector<32x2xf32>, vector<4x2xf32> -> vector<4x2xf32>
      %cst_48 = arith.constant 0.000000e+00 : f32
      %50 = vector.broadcast %cst_48 : f32 to vector<4x2xf32>
      %51 = arith.maximumf %49, %50 : vector<4x2xf32>
      %c0_49 = arith.constant 0 : index
      %c0_50 = arith.constant 0 : index
      %52 = vector.load %arg4[%c0_49, %c0_50] : memref<2x32xf32, #tpu.memory_space<vmem>>, vector<2x32xf32>
      %cst_51 = arith.constant dense<0.000000e+00> : vector<4x32xf32>
      %53 = tpu.matmul %51, %52, %cst_51 {dimension_numbers = #tpu.dot_dimension_numbers<[1], [0], [0], [1], [0, 0, 1, 1], [], []>} : vector<4x2xf32>, vector<2x32xf32>, vector<4x32xf32> -> vector<4x32xf32>
      %54 = vector.extract_strided_slice %53 {offsets = [0, 0], sizes = [2, 32], strides = [1, 1]} : vector<4x32xf32> to vector<2x32xf32>
      %55 = vector.extract_strided_slice %53 {offsets = [2, 0], sizes = [2, 32], strides = [1, 1]} : vector<4x32xf32> to vector<2x32xf32>
      %56 = arith.addf %54, %55 : vector<2x32xf32>
      %57 = arith.negf %56 : vector<2x32xf32>
      %58 = math.exp %57 : vector<2x32xf32>
      %cst_52 = arith.constant 1.000000e+00 : f32
      %59 = vector.broadcast %cst_52 : f32 to vector<2x32xf32>
      %60 = arith.addf %59, %58 : vector<2x32xf32>
      %61 = arith.divf %59, %60 : vector<2x32xf32>
      %c0_53 = arith.constant 0 : index
      %c0_54 = arith.constant 0 : index
      %62 = vector.load %arg5[%c0_53, %c0_54] : memref<2x32xf32, #tpu.memory_space<vmem>>, vector<2x32xf32>
      tpu.vector_store %arg5[%c0_53, %c0_54], %61 {strides = array<i32>} : memref<2x32xf32, #tpu.memory_space<vmem>>, vector<2x32xf32>,
    } else {
    }
    return
  }
  func.func @transform_0(%arg0: i32, %arg1: i32) -> (i32, i32, i32) {
    %c0_i32 = arith.constant 0 : i32
    %c0_i32_0 = arith.constant 0 : i32
    return %arg0, %c0_i32, %arg1 : i32, i32, i32
  }
  func.func @transform_1(%arg0: i32, %arg1: i32) -> (i32, i32) {
    %c0_i32 = arith.constant 0 : i32
    %c0_i32_0 = arith.constant 0 : i32
    %c0_i32_1 = arith.constant 0 : i32
    return %c0_i32, %c0_i32_0 : i32, i32
  }
  func.func @transform_2(%arg0: i32, %arg1: i32) -> (i32, i32) {
    %c0_i32 = arith.constant 0 : i32
    %c0_i32_0 = arith.constant 0 : i32
    %c0_i32_1 = arith.constant 0 : i32
    return %c0_i32, %c0_i32_0 : i32, i32
  }
  func.func @transform_3(%arg0: i32, %arg1: i32) -> (i32, i32) {
    %c0_i32 = arith.constant 0 : i32
    %c0_i32_0 = arith.constant 0 : i32
    return %arg0, %c0_i32 : i32, i32
  }
}

</mosaic_0001>

<bundles_post_ra>
// kernel: tpu_custom_call.1
= control target key start
LH: loop header
LB: loop body
LE: loop exit
PB: predicated region body
PF: predicated region fallthrough
CT: control target
= control target key end

     0   :  { %8 = vsyncpa [#allocation5], 0  ;;  %s587_s0 = inlined_call_operand.hbm [shape: f32[2,32,225], index: 0, kind: input, shape index: {}]   ;;  %s588_s1 = inlined_call_operand.vmem [shape: f32[32,2], index: 1, kind: input, shape index: {}]   ;;  %s589_s2 = inlined_call_operand.vmem [shape: f32[2,32], index: 2, kind: input, shape index: {}]   ;;  %s590_s3 = inlined_call_operand.hbm [shape: f32[2,32], index: 3, kind: output, shape index: {}]  }
   0x1   :  { %9 = vsyncpa [#allocation6], 0  ;;  %s14_s14 = sshll.u32 %s587_s0, 4  ;;  %s485_s15 = smov [#allocation4]   ;;  %s15_s14 = int_to_ptr.hbm [resolvable:$true] %s14_s14 }
   0x2   :  { %s16_s16 = sshll.u32 %s485_s15, 4  ;;  %s486_s17 = smov 256   ;;  %s17_s16 = int_to_ptr.vmem [resolvable:$true] %s16_s16 }
   0x3   :  { %s487_s18 = smov 16  }
   0x4   :  { %22 = dma.hbm_to_vmem [thread:$0]  %s15_s14, 2048, %s17_s16, [#allocation5], %s486_s17, %s486_s17, %s487_s18  }
   0x5   :  { %481 = dma.done.wait [#allocation5], 2048  }
   0x6   :  { %482 = vsyncadd [#allocation5], 4294965248  ;;  %v60_v0 = vlaneseq  ;;  %v56_v3 = vld [vmem:[#allocation4 + $0x40] sm:$0xff]  ;;  %v133_v4 = vld [vmem:[#allocation4 + $0x48] sm:$0xff]  ;;  %vm275_vm1 = vcmask 130112   ;;  %vm279_vm2 = vcmask 195712  }
   0x7   :  { %v52_v5 = vld [vmem:[#allocation4] sm:$0xff]  ;;  %v129_v7 = vld [vmem:[#allocation4 + $0x8] sm:$0xff]  ;;  %v134_v13 = vld [vmem:[#allocation4 + $0x58] sm:$0xff]  ;;  %vm283_vm3 = vcmask 261312   ;;  %vm292_vm4 = vcmask 1041409   ;;  %vm317_vm5 = vcmask 1043459  }
   0x8   :  { %v512_v1 = vand.u32 127, %v60_v0  ;;  %v54_v8 = vld [vmem:[#allocation4 + $0x20] sm:$0xff]  ;;  %v131_v9 = vld [vmem:[#allocation4 + $0x28] sm:$0xff]  ;;  %v130_v16 = vld [vmem:[#allocation4 + $0x18] sm:$0xff]  ;;  %vm320_vm6 = vcmask 1041408   ;;  %vm326_vm7 = vcmask 261120  }
   0x9   :  { %v135_v17 = vld [vmem:[#allocation4 + $0x68] sm:$0xff]  ;;  %v57_v18 = vld [vmem:[#allocation4 + $0x50] sm:$0xff]  ;;  %v58_v22 = vld [vmem:[#allocation4 + $0x60] sm:$0xff]  ;;  %vm352_vm8 = vcmask 15360   ;;  %s411_s30 = sshll.u32 %s590_s3, 4  ;;  %vm402_vm12 = vcmask 254976   ;;  %s412_s30 = int_to_ptr.hbm [resolvable:$true] %s411_s30 }
   0xa   :  { %v515_v2 = vadd.s32 128, %v512_v1  ;;  %v53_v20 = vld [vmem:[#allocation4 + $0x10] sm:$0xff]  ;;  %v136_v27 = vld [vmem:[#allocation4 + $0x78] sm:$0xff]  ;;  %v323_v59 = vld [vmem:[%s588_s1 + $0x8] sm:$0xff] }
   0xb   :  { %v132_v28 = vld [vmem:[#allocation4 + $0x38] sm:$0xff]  ;;  %v59_v29 = vld [vmem:[#allocation4 + $0x70] sm:$0xff]  ;;  %v322_v60 = vld [vmem:[%s588_s1] sm:$0xff] }
   0xc   :  { %vm140_vm0 = vcmp.lt.s32.totalorder %v515_v2, 225  ;;  %v55_v31 = vld [vmem:[#allocation4 + $0x30] sm:$0xff]  ;;  %v325_v54 = vld [vmem:[%s588_s1 + $0x18] sm:$0xff] }
   0xd   :  { %v145_v6 = vsel %vm140_vm0, %v133_v4, 0.0  ;;  %v141_v11 = vsel %vm140_vm0, %v129_v7, 0.0  ;;  %v143_v12 = vsel %vm140_vm0, %v131_v9, 0.0  ;;  %v146_v19 = vsel %vm140_vm0, %v134_v13, 0.0  ;;  %342 = vmatpush.msra.mxu0 %v325_v54  ;;  %v324_v58 = vld [vmem:[%s588_s1 + $0x10] sm:$0xff] }
   0xe   :  { %v169_v10 = vadd.f32 %v145_v6, %v56_v3  ;;  %v165_v14 = vadd.f32 %v141_v11, %v52_v5  ;;  %v167_v15 = vadd.f32 %v143_v12, %v54_v8  ;;  %v142_v21 = vsel %vm140_vm0, %v130_v16, 0.0 }
   0xf   :  { %v147_v23 = vsel %vm140_vm0, %v135_v17, 0.0  ;;  %v170_v24 = vadd.f32 %v146_v19, %v57_v18  ;;  %v166_v25 = vadd.f32 %v142_v21, %v53_v20  ;;  %v148_v30 = vsel %vm140_vm0, %v136_v27, 0.0  ;;  %343 = vmatpush.msra.mxu0 %v324_v58 }
  0x10   :  { %224 = vadd.xlane.f32.xlu1 %v169_v10  ;;  %216 = vadd.xlane.f32.xlu0 %v165_v14  ;;  %v171_v26 = vadd.f32 %v147_v23, %v58_v22  ;;  %v144_v32 = vsel %vm140_vm0, %v132_v28, 0.0  ;;  %v149_v33 = vsel %vm140_vm0, %v129_v7, -inf  ;;  %v172_v34 = vadd.f32 %v148_v30, %v59_v29 }
  0x11   :  { %220 = vadd.xlane.f32.xlu2 %v167_v15  ;;  %v168_v35 = vadd.f32 %v144_v32, %v55_v31  ;;  %v189_v36 = vmax.f32 %v52_v5, %v149_v33  ;;  %v153_v37 = vsel %vm140_vm0, %v133_v4, -inf  ;;  %v150_v38 = vsel %vm140_vm0, %v130_v16, -inf  ;;  %344 = vmatpush.msra.mxu0 %v323_v59 }
  0x12   :  { %v154_v39 = vsel %vm140_vm0, %v134_v13, -inf  ;;  %v193_v40 = vmax.f32 %v56_v3, %v153_v37  ;;  %v190_v41 = vmax.f32 %v53_v20, %v150_v38  ;;  %v155_v43 = vsel %vm140_vm0, %v135_v17, -inf }
  0x13   :  { %v194_v42 = vmax.f32 %v57_v18, %v154_v39  ;;  %v151_v44 = vsel %vm140_vm0, %v131_v9, -inf  ;;  %v152_v45 = vsel %vm140_vm0, %v132_v28, -inf  ;;  %v195_v46 = vmax.f32 %v58_v22, %v155_v43  ;;  %345 = vmatpush.msra.mxu0 %v322_v60 }
  0x14   :  { %v191_v47 = vmax.f32 %v54_v8, %v151_v44  ;;  %v192_v48 = vmax.f32 %v55_v31, %v152_v45  ;;  %v156_v49 = vsel %vm140_vm0, %v136_v27, -inf  ;;  %v273_v5 = vadd.s32 4294967288, %v512_v1 }
  0x15   :  { %v196_v50 = vmax.f32 %v59_v29, %v156_v49  ;;  %v277_v9 = vadd.s32 4294967280, %v512_v1  ;;  %v281_v13 = vadd.s32 4294967272, %v512_v1  ;;  %v351_v49 = vld [vmem:[%s589_s2] sm:$0x3]  ;;  %s488_s2 = smov [#allocation7]  }
  0x16   :  { %422 = vmatpush.msk.msra.mxu1 %vm320_vm6, %v351_v49  ;;  %s409_s27 = sshll.u32 %s488_s2, 4  ;;  %s410_s27 = int_to_ptr.vmem [resolvable:$true] %s409_s27 }
  0x18   :  { %226 = vadd.xlane.f32.xlu1 %v170_v24  ;;  %218 = vadd.xlane.f32.xlu0 %v166_v25 }
  0x19   :  { %228 = vadd.xlane.f32.xlu2 %v171_v26 }
  0x20   :  { %230 = vadd.xlane.f32.xlu1 %v172_v34  ;;  %222 = vadd.xlane.f32.xlu0 %v168_v35 }
  0x21   :  { %248 = vmax.xlane.f32.xlu2 %v189_v36 }
  0x28   :  { %256 = vmax.xlane.f32.xlu1 %v193_v40  ;;  %250 = vmax.xlane.f32.xlu0 %v190_v41 }
  0x29   :  { %258 = vmax.xlane.f32.xlu2 %v194_v42 }
  0x30   :  { %260 = vmax.xlane.f32.xlu1 %v195_v46  ;;  %252 = vmax.xlane.f32.xlu0 %v191_v47 }
  0x31   :  { %254 = vmax.xlane.f32.xlu2 %v192_v48 }
  0x38   :  { %262 = vmax.xlane.f32.xlu0 %v196_v50 }
  0x83   :  { %v225_v51 = vpop.xlane.xlu1 %224  ;;  %v217_v52 = vpop.xlane.xlu0 %216 }
  0x84   :  { %v221_v53 = vpop.xlane.xlu2 %220  ;;  %v236_v4 = vmul.f32 0.0044444446, %v225_v51  ;;  %v232_v8 = vmul.f32 0.0044444446, %v217_v52 }
  0x85   :  { %v234_v11 = vmul.f32 0.0044444446, %v221_v53 }
  0x86   :  { %v285_v10 = vperm.slane %v236_v4, %v512_v1  ;;  %v272_v19 = vperm.slane %v232_v8, %v512_v1 }
  0x87   :  { %v278_v25 = vperm.slane %v234_v11, %v277_v9 }
  0x8b   :  { %v227_v55 = vpop.xlane.xlu1 %226  ;;  %v219_v56 = vpop.xlane.xlu0 %218 }
  0x8c   :  { %v229_v57 = vpop.xlane.xlu2 %228  ;;  %v237_v6 = vmul.f32 0.0044444446, %v227_v55  ;;  %v233_v7 = vmul.f32 0.0044444446, %v219_v56 }
  0x8d   :  { %v238_v12 = vmul.f32 0.0044444446, %v229_v57 }
  0x8e   :  { %v286_v15 = vperm.slane %v237_v6, %v273_v5  ;;  %v274_v16 = vperm.slane %v233_v7, %v273_v5 }
  0x8f   :  { %v288_v26 = vperm.slane %v238_v12, %v277_v9 }
  0x90   :  { %v287_v29 = vsel %vm275_vm1, %v286_v15, %v285_v10  ;;  %v276_v30 = vsel %vm275_vm1, %v274_v16, %v272_v19 }
  0x91   :  { %v289_v36 = vsel %vm279_vm2, %v288_v26, %v287_v29  ;;  %v280_v39 = vsel %vm279_vm2, %v278_v25, %v276_v30 }
  0x93   :  { %v231_v61 = vpop.xlane.xlu1 %230  ;;  %v223_v62 = vpop.xlane.xlu0 %222 }
  0x94   :  { %v249_v63 = vpop.xlane.xlu2 %248  ;;  %v239_v17 = vmul.f32 0.0044444446, %v231_v61  ;;  %v235_v18 = vmul.f32 0.0044444446, %v223_v62 }
  0x95   :  { %v303_v20 = vperm.slane %v249_v63, %v512_v1 }
  0x96   :  { %v290_v31 = vperm.slane %v239_v17, %v281_v13  ;;  %v282_v32 = vperm.slane %v235_v18, %v281_v13 }
  0x98   :  { %v284_v41 = vsel %vm283_vm3, %v282_v32, %v280_v39  ;;  %v291_v42 = vsel %vm283_vm3, %v290_v31, %v289_v36 }
  0x99   :  { %v293_v46 = vsel %vm292_vm4, %v291_v42, %v284_v41 }
  0x9b   :  { %v251_v0 = vpop.xlane.xlu0 %250  ;;  %v257_v2 = vpop.xlane.xlu1 %256 }
  0x9c   :  { %v259_v3 = vpop.xlane.xlu2 %258  ;;  %v310_v21 = vperm.slane %v257_v2, %v512_v1  ;;  %v304_v22 = vperm.slane %v251_v0, %v273_v5 }
  0x9d   :  { %v311_v23 = vperm.slane %v259_v3, %v273_v5 }
  0x9e   :  { %v305_v34 = vsel %vm275_vm1, %v304_v22, %v303_v20 }
  0x9f   :  { %v312_v1 = vsel %vm275_vm1, %v311_v23, %v310_v21 }
  0xa3   :  { %v253_v14 = vpop.xlane.xlu0 %252  ;;  %v261_v24 = vpop.xlane.xlu1 %260 }
  0xa4   :  { %v306_v27 = vperm.slane %v253_v14, %v277_v9  ;;  %v255_v28 = vpop.xlane.xlu2 %254  ;;  %v313_v33 = vperm.slane %v261_v24, %v277_v9 }
  0xa5   :  { %v308_v35 = vperm.slane %v255_v28, %v281_v13 }
  0xa6   :  { %v307_v37 = vsel %vm279_vm2, %v306_v27, %v305_v34  ;;  %v314_v43 = vsel %vm279_vm2, %v313_v33, %v312_v1 }
  0xa7   :  { %v309_v44 = vsel %vm283_vm3, %v308_v35, %v307_v37 }
  0xab   :  { %v263_v38 = vpop.xlane.xlu0 %262 }
  0xac   :  { %v315_v40 = vperm.slane %v263_v38, %v281_v13 }
  0xae   :  { %v316_v45 = vsel %vm283_vm3, %v315_v40, %v314_v43 }
  0xaf   :  { %v318_v47 = vsel %vm317_vm5, %v316_v45, %v309_v44 }
  0xb0   :  { %v321_v48 = vsel %vm320_vm6, %v293_v46, %v318_v47 }
  0xb1   :  { %421 = vmatmul.msk.f32.vlgmr.msra.gmra.mxu0 %vm326_vm7, %v321_v48 }
 0x12e   :  { %v347_v50 = vpop.f32.mrf.mxu0 }
 0x12f   :  { %v350_v51 = vmax.f32 %v347_v50, 0.0 }
 0x131   :  { %423 = vmatmul.msk.f32.vlgmr.msra.gmra.mxu1 %vm352_vm8, %v350_v51 }
 0x1ae   :  { %v376_v52 = vpop.f32.mrf.mxu1 }
 0x1af   :  { %v380_v53 = vrot.slane %v376_v52, 2 }
 0x1b1   :  { %v382_v54 = vadd.f32 %v380_v53, %v376_v52 }
 0x1b3   :  { %v424_v55 = vmul.f32 -1.442695, %v382_v54 }
 0x1b5   :  { %429 = vpow2.f32 %v424_v55 }
 0x1bb   :  { %v430_v56 = vpop.eup %429 }
 0x1bc   :  { %v386_v57 = vadd.f32 1.0, %v430_v56 }
 0x1be   :  { %431 = vrcp.f32 %v386_v57  ;;  %v398_v61 = vand.u32 2147483648, %v386_v57  ;;  %v396_v63 = vand.u32 2147483647, %v386_v57  ;;  %vm392_vm10 = vweird.f32 %v386_v57 }
 0x1c0   :  { %v399_v2 = vor.u32 1.1754944e-38, %v398_v61  ;;  %vm397_vm13 = vcmp.eq.f32.partialorder %v396_v63, 8.507059e+37 }
 0x1c4   :  { %v432_v58 = vpop.eup %431 }
 0x1c5   :  { %v388_v59 = vmul.f32 %v432_v58, %v386_v57  ;;  %vm393_vm9 = vweird.f32 %v432_v58 }
 0x1c6   :  { %vm394_vm11 = vmor %vm392_vm10, %vm393_vm9 }
 0x1c7   :  { %v389_v60 = vsub.f32 1.0, %v388_v59 }
 0x1c9   :  { %v390_v62 = vmul.f32 %v432_v58, %v389_v60 }
 0x1cb   :  { %v391_v0 = vadd.f32 %v432_v58, %v390_v62 }
 0x1cd   :  { %v395_v3 = vsel %vm394_vm11, %v432_v58, %v391_v0 }
 0x1ce   :  { %v400_v4 = vsel %vm397_vm13, %v399_v2, %v395_v3 }
 0x1cf   :  { %403 = vst.msk [vmem:[#allocation7] sm:$0x3] %vm402_vm12, %v400_v4 }
 0x1d0   :  { %414 = dma.vmem_to_hbm [thread:$0]  %s410_s27, 32, %s412_s30, [#allocation6]  }
 0x1d1   :  { %483 = dma.done.wait [#allocation6], 32  }
 0x1d2   :  { %484 = vsyncadd [#allocation6], 4294967264 }
 0x1d3   :  { %419 = vsyncpa [#allocation5], 1 }
 0x1d4   :  { %420 = vsyncpa [#allocation6], 1 }

</bundles_post_ra>
